<compile_context>
chip_gen: v5e
topology: v5e:2x2
jax: 0.10.0
libtpu: 0.0.40
codegen_flags: <defaults>
</compile_context>

<pallas_src>
import jax
import jax.numpy as jnp
from jax.experimental import pallas as pl
from jax.experimental.pallas import tpu as pltpu

LANE = 128


# ----------------------------------------------------------------------------
# Fused kernel: cell-type gating + 2x SAGEConv(mean) (+ ReLU between)
# All activations stay resident in VMEM/vregs.
# ----------------------------------------------------------------------------
def fused_scxgnn_kernel(onehot_ref, feats_ref, gate_tbl_ref, adj_ref,
                        w1_ref, b1_ref, w2_ref, b2_ref, o_ref):
    # --- cell-type gating: gate = sigmoid(emb)[ids] via one-hot matmul (MXU) ---
    gate = jnp.dot(onehot_ref[...], gate_tbl_ref[...],
                   preferred_element_type=jnp.float32)            # (N, F)
    gated = feats_ref[...] * gate                                 # (N, F) f32

    adj = adj_ref[...]                                            # (N, N) bf16

    # --- layer 1: SAGEConv(mean) + ReLU, merged self/neigh matmul ---
    neigh1 = jnp.dot(adj, gated.astype(jnp.bfloat16),
                     preferred_element_type=jnp.float32)          # (N, F)
    cat1 = jnp.concatenate([gated, neigh1], axis=1).astype(jnp.bfloat16)  # (N, 2F)
    h = jnp.dot(cat1, w1_ref[...], preferred_element_type=jnp.float32) + b1_ref[...]
    h = jnp.maximum(h, 0.0)                                       # (N, H) f32

    # --- layer 2: SAGEConv(mean), lane-padded output ---
    neigh2 = jnp.dot(adj, h.astype(jnp.bfloat16),
                     preferred_element_type=jnp.float32)          # (N, H)
    cat2 = jnp.concatenate([h, neigh2], axis=1).astype(jnp.bfloat16)      # (N, 2H)
    out = jnp.dot(cat2, w2_ref[...], preferred_element_type=jnp.float32) + b2_ref[...]

    o_ref[...] = out.astype(o_ref.dtype)                          # (N, C_pad) lane-dense


# ----------------------------------------------------------------------------
# Wrapper: layout plumbing in JAX, hot path in the single fused kernel.
# ----------------------------------------------------------------------------
@jax.jit
def model_forward(x, adj_norm, params):
    n = x.shape[0]
    in_feats = x.shape[1] - 1
    n_types = params["emb"].shape[0]
    h_feats = params["w_self1"].shape[1]
    num_classes = params["w_self2"].shape[1]
    c_pad = max(LANE, ((num_classes + LANE - 1) // LANE) * LANE)

    ids = x[:, 0].astype(jnp.int32)                     # small-int ids stored in f32 col 0
    feats = x[:, 1:].astype(jnp.float32)

    # Wrapper-side plumbing (tiny, one-time per call):
    onehot = (ids[:, None] == jnp.arange(n_types, dtype=jnp.int32)[None, :]
              ).astype(jnp.float32)                               # (N, T)
    gate_tbl = jax.nn.sigmoid(params["emb"].astype(jnp.float32))  # (T, F), sigmoid hoisted
    adj_bf16 = adj_norm.astype(jnp.bfloat16)                      # (N, N)

    # Stacked weights: [W_self; W_neigh] so self+neigh collapse into one matmul.
    w1 = jnp.concatenate([params["w_self1"], params["w_neigh1"]],
                         axis=0).astype(jnp.bfloat16)             # (2F, H)
    b1 = params["b1"].astype(jnp.float32)                         # (1, H)
    w2 = jnp.concatenate([params["w_self2"], params["w_neigh2"]], axis=0)
    w2 = jnp.pad(w2, ((0, 0), (0, c_pad - num_classes))).astype(jnp.bfloat16)  # (2H, C_pad)
    b2 = jnp.pad(params["b2"], ((0, 0), (0, c_pad - num_classes))).astype(jnp.float32)

    out_pad = pl.pallas_call(
        fused_scxgnn_kernel,
        out_shape=jax.ShapeDtypeStruct((n, c_pad), jnp.float32),
        grid_spec=pl.GridSpec(
            grid=(1,),  # whole problem fits VMEM comfortably at this size
            in_specs=[
                pl.BlockSpec((n, n_types), lambda i: (0, 0)),        # one-hot ids
                pl.BlockSpec((n, in_feats), lambda i: (0, 0)),       # raw features
                pl.BlockSpec((n_types, in_feats), lambda i: (0, 0)), # sigmoid(emb)
                pl.BlockSpec((n, n), lambda i: (0, 0)),              # row-normalized adjacency
                pl.BlockSpec((2 * in_feats, h_feats), lambda i: (0, 0)),
                pl.BlockSpec((1, h_feats), lambda i: (0, 0)),
                pl.BlockSpec((2 * h_feats, c_pad), lambda i: (0, 0)),
                pl.BlockSpec((1, c_pad), lambda i: (0, 0)),
            ],
            out_specs=pl.BlockSpec((n, c_pad), lambda i: (0, 0)),
        ),
        compiler_params=pltpu.CompilerParams(dimension_semantics=("arbitrary",)),
    )(onehot, feats, gate_tbl, adj_bf16, w1, b1, w2, b2)

    return out_pad[:, :num_classes]


# ----------------------------------------------------------------------------
# Pure-JAX f32 reference (module semantics, eval mode)
# ----------------------------------------------------------------------------
def reference_forward(x, adj_norm, params):
    ids = x[:, 0].astype(jnp.int32)
    feats = x[:, 1:]
    gated = feats * jax.nn.sigmoid(params["emb"][ids])
    neigh = adj_norm @ gated
    h = gated @ params["w_self1"] + neigh @ params["w_neigh1"] + params["b1"]
    h = jnp.maximum(h, 0.0)
    neigh2 = adj_norm @ h
    return h @ params["w_self2"] + neigh2 @ params["w_neigh2"] + params["b2"]


if __name__ == "__main__":
    N = 128
    in_feats = 32
    h_feats = 32
    num_classes = 8
    num_cell_types = 24

    key = jax.random.PRNGKey(0)
    ks = jax.random.split(key, 10)

    # --- synthetic inputs (deterministic) ---
    cell_ids = jax.random.randint(ks[0], (N,), 0, num_cell_types)
    feats = jax.random.normal(ks[1], (N, in_feats), dtype=jnp.float32)
    # scxGNN_features = hstack([cell_type_ids, features])
    x = jnp.concatenate([cell_ids.astype(jnp.float32)[:, None], feats], axis=1)

    # random graph + reverse edges + self loops, row-normalized (mean aggregation)
    adj_rand = (jax.random.uniform(ks[2], (N, N)) < (8.0 / N)).astype(jnp.float32)
    adj = jnp.maximum(jnp.maximum(adj_rand, adj_rand.T), jnp.eye(N, dtype=jnp.float32))
    adj_norm = adj / adj.sum(axis=1, keepdims=True)

    # --- deterministic parameters (shapes from Model.__init__) ---
    params = {
        "emb": 0.1 * jax.random.normal(ks[3], (num_cell_types, in_feats), jnp.float32),
        "w_self1": 0.1 * jax.random.normal(ks[4], (in_feats, h_feats), jnp.float32),
        "w_neigh1": 0.1 * jax.random.normal(ks[5], (in_feats, h_feats), jnp.float32),
        "b1": 0.01 * jax.random.normal(ks[6], (1, h_feats), jnp.float32),
        "w_self2": 0.1 * jax.random.normal(ks[7], (h_feats, num_classes), jnp.float32),
        "w_neigh2": 0.1 * jax.random.normal(ks[8], (h_feats, num_classes), jnp.float32),
        "b2": 0.01 * jax.random.normal(ks[9], (1, num_classes), jnp.float32),
    }

    out = model_forward(x, adj_norm, params)
    out = jax.block_until_ready(out)

    ref = reference_forward(x, adj_norm, params)
    assert out.shape == (N, num_classes)
    # bf16 matmul operands (f32 accumulation) vs. f32 reference -> relaxed tolerance
    assert jnp.allclose(out, ref, atol=3e-2, rtol=3e-2), float(jnp.max(jnp.abs(out - ref)))

    print("KERNEL_OK")
</pallas_src>

<mosaic_0001>
module attributes {stable_mosaic.version = 11 : i64} {
  func.func @fused_scxgnn_kernel(%arg0: i32, %arg1: memref<128x24xf32, #tpu.memory_space<vmem>>, %arg2: memref<128x32xf32, #tpu.memory_space<vmem>>, %arg3: memref<24x32xf32, #tpu.memory_space<vmem>>, %arg4: memref<128x128xbf16, #tpu.memory_space<vmem>>, %arg5: memref<64x32xbf16, #tpu.memory_space<vmem>>, %arg6: memref<1x32xf32, #tpu.memory_space<vmem>>, %arg7: memref<64x128xbf16, #tpu.memory_space<vmem>>, %arg8: memref<1x128xf32, #tpu.memory_space<vmem>>, %arg9: memref<128x128xf32, #tpu.memory_space<vmem>>) attributes {dimension_semantics = [#tpu.dimension_semantics<arbitrary>], iteration_bounds = array<i64: 1>, scalar_prefetch = 0 : i64, scratch_operands = 0 : i64, tpu.core_type = #tpu.core_type<tc>, window_params = [{pipeline_mode = #tpu.pipeline_mode<synchronous>, transform_indices = @transform_0, window_bounds = array<i64: 128, 24>}, {pipeline_mode = #tpu.pipeline_mode<synchronous>, transform_indices = @transform_1, window_bounds = array<i64: 128, 32>}, {pipeline_mode = #tpu.pipeline_mode<synchronous>, transform_indices = @transform_2, window_bounds = array<i64: 24, 32>}, {pipeline_mode = #tpu.pipeline_mode<synchronous>, transform_indices = @transform_3, window_bounds = array<i64: 128, 128>}, {pipeline_mode = #tpu.pipeline_mode<synchronous>, transform_indices = @transform_4, window_bounds = array<i64: 64, 32>}, {pipeline_mode = #tpu.pipeline_mode<synchronous>, transform_indices = @transform_5, window_bounds = array<i64: 1, 32>}, {pipeline_mode = #tpu.pipeline_mode<synchronous>, transform_indices = @transform_6, window_bounds = array<i64: 64, 128>}, {pipeline_mode = #tpu.pipeline_mode<synchronous>, transform_indices = @transform_7, window_bounds = array<i64: 1, 128>}, {pipeline_mode = #tpu.pipeline_mode<synchronous>, transform_indices = @transform_8, window_bounds = array<i64: 128, 128>}]} {
    %c0 = arith.constant 0 : index
    %c0_0 = arith.constant 0 : index
    %0 = vector.load %arg1[%c0, %c0_0] : memref<128x24xf32, #tpu.memory_space<vmem>>, vector<128x24xf32>
    %c0_1 = arith.constant 0 : index
    %c0_2 = arith.constant 0 : index
    %1 = vector.load %arg3[%c0_1, %c0_2] : memref<24x32xf32, #tpu.memory_space<vmem>>, vector<24x32xf32>
    %cst = arith.constant dense<0.000000e+00> : vector<128x32xf32>
    %2 = tpu.matmul %0, %1, %cst {dimension_numbers = #tpu.dot_dimension_numbers<[1], [0], [0], [1], [0, 0, 1, 1], [], []>} : vector<128x24xf32>, vector<24x32xf32>, vector<128x32xf32> -> vector<128x32xf32>
    %c0_3 = arith.constant 0 : index
    %c0_4 = arith.constant 0 : index
    %3 = vector.load %arg2[%c0_3, %c0_4] : memref<128x32xf32, #tpu.memory_space<vmem>>, vector<128x32xf32>
    %4 = arith.mulf %3, %2 : vector<128x32xf32>
    %c0_5 = arith.constant 0 : index
    %c0_6 = arith.constant 0 : index
    %5 = vector.load %arg4[%c0_5, %c0_6] : memref<128x128xbf16, #tpu.memory_space<vmem>>, vector<128x128xbf16>
    %6 = arith.truncf %4 : vector<128x32xf32> to vector<128x32xbf16>
    %cst_7 = arith.constant dense<0.000000e+00> : vector<128x32xf32>
    %7 = tpu.matmul %5, %6, %cst_7 {dimension_numbers = #tpu.dot_dimension_numbers<[1], [0], [0], [1], [0, 0, 1, 1], [], []>} : vector<128x128xbf16>, vector<128x32xbf16>, vector<128x32xf32> -> vector<128x32xf32>
    %8 = tpu.concatenate %4, %7 in 1 : vector<128x32xf32>, vector<128x32xf32> -> vector<128x64xf32>
    %9 = arith.truncf %8 : vector<128x64xf32> to vector<128x64xbf16>
    %c0_8 = arith.constant 0 : index
    %c0_9 = arith.constant 0 : index
    %10 = vector.load %arg5[%c0_8, %c0_9] : memref<64x32xbf16, #tpu.memory_space<vmem>>, vector<64x32xbf16>
    %cst_10 = arith.constant dense<0.000000e+00> : vector<128x32xf32>
    %11 = tpu.matmul %9, %10, %cst_10 {dimension_numbers = #tpu.dot_dimension_numbers<[1], [0], [0], [1], [0, 0, 1, 1], [], []>} : vector<128x64xbf16>, vector<64x32xbf16>, vector<128x32xf32> -> vector<128x32xf32>
    %c0_11 = arith.constant 0 : index
    %c0_12 = arith.constant 0 : index
    %12 = vector.load %arg6[%c0_11, %c0_12] : memref<1x32xf32, #tpu.memory_space<vmem>>, vector<1x32xf32>
    %13 = vector.broadcast %12 : vector<1x32xf32> to vector<128x32xf32>
    %14 = arith.addf %11, %13 : vector<128x32xf32>
    %cst_13 = arith.constant 0.000000e+00 : f32
    %15 = vector.broadcast %cst_13 : f32 to vector<128x32xf32>
    %16 = arith.maximumf %14, %15 : vector<128x32xf32>
    %17 = arith.truncf %16 : vector<128x32xf32> to vector<128x32xbf16>
    %cst_14 = arith.constant dense<0.000000e+00> : vector<128x32xf32>
    %18 = tpu.matmul %5, %17, %cst_14 {dimension_numbers = #tpu.dot_dimension_numbers<[1], [0], [0], [1], [0, 0, 1, 1], [], []>} : vector<128x128xbf16>, vector<128x32xbf16>, vector<128x32xf32> -> vector<128x32xf32>
    %19 = tpu.concatenate %16, %18 in 1 : vector<128x32xf32>, vector<128x32xf32> -> vector<128x64xf32>
    %20 = arith.truncf %19 : vector<128x64xf32> to vector<128x64xbf16>
    %c0_15 = arith.constant 0 : index
    %c0_16 = arith.constant 0 : index
    %21 = vector.load %arg7[%c0_15, %c0_16] : memref<64x128xbf16, #tpu.memory_space<vmem>>, vector<64x128xbf16>
    %cst_17 = arith.constant dense<0.000000e+00> : vector<128x128xf32>
    %22 = tpu.matmul %20, %21, %cst_17 {dimension_numbers = #tpu.dot_dimension_numbers<[1], [0], [0], [1], [0, 0, 1, 1], [], []>} : vector<128x64xbf16>, vector<64x128xbf16>, vector<128x128xf32> -> vector<128x128xf32>
    %c0_18 = arith.constant 0 : index
    %c0_19 = arith.constant 0 : index
    %23 = vector.load %arg8[%c0_18, %c0_19] : memref<1x128xf32, #tpu.memory_space<vmem>>, vector<1x128xf32>
    %24 = vector.broadcast %23 : vector<1x128xf32> to vector<128x128xf32>
    %25 = arith.addf %22, %24 : vector<128x128xf32>
    %c0_20 = arith.constant 0 : index
    %c0_21 = arith.constant 0 : index
    %26 = vector.load %arg9[%c0_20, %c0_21] : memref<128x128xf32, #tpu.memory_space<vmem>>, vector<128x128xf32>
    tpu.vector_store %arg9[%c0_20, %c0_21], %25 {strides = array<i32>} : memref<128x128xf32, #tpu.memory_space<vmem>>, vector<128x128xf32>,
    return
  }
  func.func @transform_0(%arg0: i32) -> (i32, i32) {
    %c0_i32 = arith.constant 0 : i32
    %c0_i32_0 = arith.constant 0 : i32
    %c0_i32_1 = arith.constant 0 : i32
    return %c0_i32, %c0_i32_0 : i32, i32
  }
  func.func @transform_1(%arg0: i32) -> (i32, i32) {
    %c0_i32 = arith.constant 0 : i32
    %c0_i32_0 = arith.constant 0 : i32
    %c0_i32_1 = arith.constant 0 : i32
    return %c0_i32, %c0_i32_0 : i32, i32
  }
  func.func @transform_2(%arg0: i32) -> (i32, i32) {
    %c0_i32 = arith.constant 0 : i32
    %c0_i32_0 = arith.constant 0 : i32
    %c0_i32_1 = arith.constant 0 : i32
    return %c0_i32, %c0_i32_0 : i32, i32
  }
  func.func @transform_3(%arg0: i32) -> (i32, i32) {
    %c0_i32 = arith.constant 0 : i32
    %c0_i32_0 = arith.constant 0 : i32
    %c0_i32_1 = arith.constant 0 : i32
    return %c0_i32, %c0_i32_0 : i32, i32
  }
  func.func @transform_4(%arg0: i32) -> (i32, i32) {
    %c0_i32 = arith.constant 0 : i32
    %c0_i32_0 = arith.constant 0 : i32
    %c0_i32_1 = arith.constant 0 : i32
    return %c0_i32, %c0_i32_0 : i32, i32
  }
  func.func @transform_5(%arg0: i32) -> (i32, i32) {
    %c0_i32 = arith.constant 0 : i32
    %c0_i32_0 = arith.constant 0 : i32
    %c0_i32_1 = arith.constant 0 : i32
    return %c0_i32, %c0_i32_0 : i32, i32
  }
  func.func @transform_6(%arg0: i32) -> (i32, i32) {
    %c0_i32 = arith.constant 0 : i32
    %c0_i32_0 = arith.constant 0 : i32
    %c0_i32_1 = arith.constant 0 : i32
    return %c0_i32, %c0_i32_0 : i32, i32
  }
  func.func @transform_7(%arg0: i32) -> (i32, i32) {
    %c0_i32 = arith.constant 0 : i32
    %c0_i32_0 = arith.constant 0 : i32
    %c0_i32_1 = arith.constant 0 : i32
    return %c0_i32, %c0_i32_0 : i32, i32
  }
  func.func @transform_8(%arg0: i32) -> (i32, i32) {
    %c0_i32 = arith.constant 0 : i32
    %c0_i32_0 = arith.constant 0 : i32
    %c0_i32_1 = arith.constant 0 : i32
    return %c0_i32, %c0_i32_0 : i32, i32
  }
}

</mosaic_0001>

<bundles_post_ra>
// kernel: model_forward.1
= control target key start
LH: loop header
LB: loop body
LE: loop exit
PB: predicated region body
PF: predicated region fallthrough
CT: control target
= control target key end

     0   :  { %vm49_vm0 = vcmask 195584   ;;  %s1009_s18 = smov 32   ;;  %vm380_vm1 = vcmask 261120   ;;  %vm441_vm2 = vcmask 523264   ;;  %s1536_s2 = inlined_call_operand.vmem [shape: f32[24,32], index: 2, kind: input, shape index: {}]   ;;  %s1537_s0 = inlined_call_operand.vmem [shape: f32[128,24], index: 0, kind: input, shape index: {}]   ;;  %s1538_s1 = inlined_call_operand.vmem [shape: f32[128,32], index: 1, kind: input, shape index: {}]   ;;  %s1539_s3 = inlined_call_operand.vmem [shape: bf16[128,128], index: 3, kind: input, shape index: {}]   ;;  %s1540_s4 = inlined_call_operand.vmem [shape: bf16[64,32], index: 4, kind: input, shape index: {}]   ;;  %s1541_s5 = inlined_call_operand.vmem [shape: f32[1,32], index: 5, kind: input, shape index: {}]   ;;  %s1542_s6 = inlined_call_operand.vmem [shape: bf16[64,128], index: 6, kind: input, shape index: {}]   ;;  %s1543_s7 = inlined_call_operand.vmem [shape: f32[1,128], index: 7, kind: input, shape index: {}]   ;;  %s1544_s8 = inlined_call_operand.vmem [shape: f32[128,128], index: 8, kind: output, shape index: {}]  }
   0x1   :  { %v48_v0 = vld [vmem:[%s1536_s2 + $0x10] sm:$0xff]  ;;  %v47_v1 = vld [vmem:[%s1536_s2 + $0x8] sm:$0xff]  ;;  %v46_v2 = vld [vmem:[%s1536_s2] sm:$0xff] }
   0x2   :  { %917 = vmatpush.msra.mxu1 %v48_v0  ;;  %918 = vmatpush.msra.mxu2 %v48_v0  ;;  %v33_v3 = vld [vmem:[%s1537_s0 + $0x18] sm:$0xff]  ;;  %v42_v5 = vld [vmem:[%s1537_s0 + $0x60] sm:$0xff]  ;;  %v43_v9 = vld [vmem:[%s1537_s0 + $0x68] sm:$0xff] }
   0x3   :  { %919 = vmatpush.msra.mxu3 %v48_v0  ;;  %111 = vmatpush.msra.mxu0 %v48_v0  ;;  %v37_v4 = vld [vmem:[%s1537_s0 + $0x38] sm:$0xff]  ;;  %v30_v6 = vld [vmem:[%s1537_s0] sm:$0xff]  ;;  %v31_v10 = vld [vmem:[%s1537_s0 + $0x8] sm:$0xff] }
   0x4   :  { %920 = vmatpush.msra.mxu1 %v47_v1  ;;  %921 = vmatpush.msra.mxu2 %v47_v1  ;;  %v34_v7 = vld [vmem:[%s1537_s0 + $0x20] sm:$0xff]  ;;  %v35_v11 = vld [vmem:[%s1537_s0 + $0x28] sm:$0xff]  ;;  %v44_v13 = vld [vmem:[%s1537_s0 + $0x70] sm:$0xff] }
   0x5   :  { %922 = vmatpush.msra.mxu3 %v47_v1  ;;  %112 = vmatpush.msra.mxu0 %v47_v1  ;;  %v38_v8 = vld [vmem:[%s1537_s0 + $0x40] sm:$0xff]  ;;  %v39_v12 = vld [vmem:[%s1537_s0 + $0x48] sm:$0xff]  ;;  %v32_v14 = vld [vmem:[%s1537_s0 + $0x10] sm:$0xff] }
   0x6   :  { %923 = vmatpush.msra.mxu1 %v46_v2  ;;  %924 = vmatpush.msra.mxu2 %v46_v2  ;;  %v36_v15 = vld [vmem:[%s1537_s0 + $0x30] sm:$0xff]  ;;  %v45_v17 = vld [vmem:[%s1537_s0 + $0x78] sm:$0xff]  ;;  %v176_v30 = vld [vmem:[%s1538_s1 + $0x68] sm:$0xff] }
   0x7   :  { %925 = vmatpush.msra.mxu3 %v46_v2  ;;  %808 = vmatmul.msk.f32.vlgmr.msra.gmra.mxu1 %vm49_vm0, %v33_v3  ;;  %v40_v16 = vld [vmem:[%s1537_s0 + $0x50] sm:$0xff]  ;;  %v41_v18 = vld [vmem:[%s1537_s0 + $0x58] sm:$0xff]  ;;  %v175_v35 = vld [vmem:[%s1538_s1 + $0x60] sm:$0xff] }
   0x8   :  { %812 = vmatmul.msk.f32.vlgmr.msra.gmra.mxu2 %vm49_vm0, %v37_v4  ;;  %817 = vmatmul.msk.f32.vlgmr.msra.gmra.mxu3 %vm49_vm0, %v42_v5  ;;  %v177_v27 = vld [vmem:[%s1538_s1 + $0x70] sm:$0xff]  ;;  %v178_v28 = vld [vmem:[%s1538_s1 + $0x78] sm:$0xff]  ;;  %v172_v43 = vld [vmem:[%s1538_s1 + $0x48] sm:$0xff] }
   0x9   :  { %113 = vmatpush.msra.mxu0 %v46_v2  ;;  %v173_v40 = vld [vmem:[%s1538_s1 + $0x50] sm:$0xff]  ;;  %v174_v41 = vld [vmem:[%s1538_s1 + $0x58] sm:$0xff]  ;;  %v171_v48 = vld [vmem:[%s1538_s1 + $0x40] sm:$0xff] }
   0xa   :  { %805 = vmatmul.msk.f32.vlgmr.msra.gmra.mxu0 %vm49_vm0, %v30_v6  ;;  %v169_v52 = vld [vmem:[%s1538_s1 + $0x30] sm:$0xff]  ;;  %v170_v54 = vld [vmem:[%s1538_s1 + $0x38] sm:$0xff]  ;;  %v167_v57 = vld [vmem:[%s1538_s1 + $0x20] sm:$0xff] }
   0xb   :  { %v168_v58 = vld [vmem:[%s1538_s1 + $0x28] sm:$0xff]  ;;  %v166_v63 = vld [vmem:[%s1538_s1 + $0x18] sm:$0xff]  ;;  %v165_v1 = vld [vmem:[%s1538_s1 + $0x10] sm:$0xff] }
   0xc   :  { %v163_v5 = vld [vmem:[%s1538_s1] sm:$0xff]  ;;  %v164_v6 = vld [vmem:[%s1538_s1 + $0x8] sm:$0xff] }
   0xf   :  { %809 = vmatmul.msk.f32.gmra.mxu1 %vm49_vm0, %v34_v7 }
  0x10   :  { %813 = vmatmul.msk.f32.gmra.mxu2 %vm49_vm0, %v38_v8  ;;  %818 = vmatmul.msk.f32.gmra.mxu3 %vm49_vm0, %v43_v9 }
  0x12   :  { %806 = vmatmul.msk.f32.gmra.mxu0 %vm49_vm0, %v31_v10 }
  0x17   :  { %810 = vmatmul.msk.f32.gmra.mxu1 %vm49_vm0, %v35_v11  ;;  %v1227_v11 = vld [vmem:[%s1539_s3] sm:$0xff] }
  0x18   :  { %814 = vmatmul.msk.f32.gmra.mxu2 %vm49_vm0, %v39_v12  ;;  %819 = vmatmul.msk.f32.gmra.mxu3 %vm49_vm0, %v44_v13  ;;  %v1233_v12 = vld [vmem:[%s1539_s3 + $0x8] sm:$0xff]  ;;  %v1239_v13 = vld [vmem:[%s1539_s3 + $0x10] sm:$0xff] }
  0x1a   :  { %807 = vmatmul.msk.f32.gmra.mxu0 %vm49_vm0, %v32_v14  ;;  %v1245_v14 = vld [vmem:[%s1539_s3 + $0x18] sm:$0xff] }
  0x1f   :  { %811 = vmatmul.msk.f32.gmra.mxu1 %vm49_vm0, %v36_v15  ;;  %v1251_v15 = vld [vmem:[%s1539_s3 + $0x20] sm:$0xff] }
  0x20   :  { %815 = vmatmul.msk.f32.gmra.mxu2 %vm49_vm0, %v40_v16  ;;  %820 = vmatmul.msk.f32.gmra.mxu3 %vm49_vm0, %v45_v17  ;;  %v1257_v16 = vld [vmem:[%s1539_s3 + $0x28] sm:$0xff]  ;;  %v1263_v17 = vld [vmem:[%s1539_s3 + $0x30] sm:$0xff] }
  0x28   :  { %816 = vmatmul.msk.f32.gmra.mxu2 %vm49_vm0, %v41_v18  ;;  %v1269_v18 = vld [vmem:[%s1539_s3 + $0x38] sm:$0xff] }
  0x84   :  { %v124_v21 = vpop.f32.mrf.mxu1 }
  0x85   :  { %v1204_v2 = vmul.f32 %v166_v63, %v124_v21 }
  0x87   :  { %v115_v29 = vpop.f32.mrf.mxu0 }
  0x88   :  { %v1216_v7 = vmul.f32 %v163_v5, %v115_v29 }
  0x8b   :  { %v136_v19 = vpop.f32.mrf.mxu2  ;;  %v151_v20 = vpop.f32.mrf.mxu3 }
  0x8c   :  { %v127_v24 = vpop.f32.mrf.mxu1  ;;  %v1148_v39 = vmul.f32 %v175_v35, %v151_v20  ;;  %v1190_v59 = vmul.f32 %v170_v54, %v136_v19  ;;  %v911_v35 = vld [vmem:[%s1540_s4 + $0x10] sm:$0xff] }
  0x8d   :  { %v1192_v60 = vmul.f32 %v167_v57, %v127_v24 }
  0x8f   :  { %v118_v47 = vpop.f32.mrf.mxu0 }
  0x90   :  { %v1218_v8 = vmul.f32 %v164_v6, %v118_v47 }
  0x92   :  { %v211_v10 = vpack.c.bf16 %v1218_v8, %v1216_v7 }
  0x93   :  { %v139_v22 = vpop.f32.mrf.mxu2  ;;  %v154_v23 = vpop.f32.mrf.mxu3 }
  0x94   :  { %v130_v36 = vpop.f32.mrf.mxu1  ;;  %v1144_v37 = vmul.f32 %v176_v30, %v154_v23  ;;  %v1175_v53 = vmul.f32 %v171_v48, %v139_v22 }
  0x95   :  { %v1194_v61 = vmul.f32 %v168_v58, %v130_v36 }
  0x96   :  { %v217_v42 = vpack.c.bf16 %v1144_v37, %v1148_v39 }
  0x97   :  { %v121_v0 = vpop.f32.mrf.mxu0  ;;  %v213_v4 = vpack.c.bf16 %v1194_v61, %v1192_v60 }
  0x98   :  { %v1206_v3 = vmul.f32 %v165_v1, %v121_v0 }
  0x9a   :  { %v212_v9 = vpack.c.bf16 %v1204_v2, %v1206_v3 }
  0x9b   :  { %v142_v25 = vpop.f32.mrf.mxu2  ;;  %v157_v26 = vpop.f32.mrf.mxu3 }
  0x9c   :  { %v1137_v33 = vmul.f32 %v177_v27, %v157_v26  ;;  %v1168_v49 = vmul.f32 %v172_v43, %v142_v25  ;;  %v133_v51 = vpop.f32.mrf.mxu1 }
  0x9d   :  { %v1180_v55 = vmul.f32 %v169_v52, %v133_v51 }
  0x9e   :  { %v215_v56 = vpack.c.bf16 %v1168_v49, %v1175_v53 }
  0x9f   :  { %v214_v62 = vpack.c.bf16 %v1190_v59, %v1180_v55 }
  0xa3   :  { %v145_v31 = vpop.f32.mrf.mxu2  ;;  %v160_v32 = vpop.f32.mrf.mxu3 }
  0xa4   :  { %v1139_v34 = vmul.f32 %v178_v28, %v160_v32  ;;  %v1161_v45 = vmul.f32 %v173_v40, %v145_v31  ;;  %v912_v31 = vld [vmem:[%s1540_s4 + $0x18] sm:$0xff] }
  0xa5   :  { %470 = vmatpush.bf16.msrb.mxu2 %v912_v31 }
  0xa6   :  { %v218_v38 = vpack.c.bf16 %v1139_v34, %v1137_v33 }
  0xa8   :  { %267 = vmatpush.bf16.msrb.mxu1 %v218_v38 }
  0xa9   :  { %471 = vmatpush.bf16.msrb.mxu2 %v911_v35 }
  0xab   :  { %v148_v44 = vpop.f32.mrf.mxu2 }
  0xac   :  { %v1163_v46 = vmul.f32 %v174_v41, %v148_v44  ;;  %268 = vmatpush.bf16.msrb.mxu1 %v217_v42  ;;  %v910_v41 = vld [vmem:[%s1540_s4 + $0x8] sm:$0xff]  ;;  %v909_v44 = vld [vmem:[%s1540_s4] sm:$0xff] }
  0xad   :  { %472 = vmatpush.bf16.msrb.mxu2 %v910_v41 }
  0xae   :  { %v216_v50 = vpack.c.bf16 %v1163_v46, %v1161_v45 }
  0xb0   :  { %269 = vmatpush.bf16.msrb.mxu1 %v216_v50 }
  0xb1   :  { %473 = vmatpush.bf16.msrb.mxu2 %v909_v44 }
  0xb4   :  { %270 = vmatpush.bf16.msrb.mxu1 %v215_v56 }
  0xb8   :  { %271 = vmatpush.bf16.msrb.mxu1 %v214_v62 }
  0xbc   :  { %272 = vmatpush.bf16.msrb.mxu1 %v213_v4 }
  0xc0   :  { %273 = vmatpush.bf16.msrb.mxu1 %v212_v9 }
  0xc4   :  { %274 = vmatpush.bf16.msrb.mxu1 %v211_v10 }
  0xc7   :  { %275 = vmatmul.bf16.vlgmr.msrb.gmra.mxu1 %v1227_v11 }
  0xd7   :  { %280 = vmatmul.bf16.gmra.mxu1 %v1233_v12 }
  0xe7   :  { %285 = vmatmul.bf16.gmra.mxu1 %v1239_v13 }
  0xf7   :  { %290 = vmatmul.bf16.gmra.mxu1 %v1245_v14 }
 0x107   :  { %295 = vmatmul.bf16.gmra.mxu1 %v1251_v15 }
 0x117   :  { %300 = vmatmul.bf16.gmra.mxu1 %v1257_v16 }
 0x127   :  { %305 = vmatmul.bf16.gmra.mxu1 %v1263_v17 }
 0x137   :  { %310 = vmatmul.bf16.gmra.mxu1 %v1269_v18 }
 0x144   :  { %v276_v19 = vpop.f32.mrf.mxu1 }
 0x14c   :  { %v278_v20 = vpop.f32.mrf.mxu1 }
 0x14d   :  { %v927_v21 = vpack.i.bf16 %v278_v20, %v276_v19 }
 0x14f   :  { %928 = vrot.lane.b32.xlu0 %v927_v21, %s1009_s18 }
 0x154   :  { %v281_v22 = vpop.f32.mrf.mxu1 }
 0x15c   :  { %v283_v23 = vpop.f32.mrf.mxu1 }
 0x15d   :  { %v932_v24 = vpack.i.bf16 %v283_v23, %v281_v22 }
 0x15f   :  { %933 = vrot.lane.b32.xlu0 %v932_v24, %s1009_s18 }
 0x164   :  { %v286_v25 = vpop.f32.mrf.mxu1 }
 0x16c   :  { %v288_v26 = vpop.f32.mrf.mxu1 }
 0x16d   :  { %v937_v27 = vpack.i.bf16 %v288_v26, %v286_v25 }
 0x16f   :  { %938 = vrot.lane.b32.xlu1 %v937_v27, %s1009_s18 }
 0x174   :  { %v291_v28 = vpop.f32.mrf.mxu1 }
 0x17c   :  { %v293_v29 = vpop.f32.mrf.mxu1 }
 0x17d   :  { %v942_v30 = vpack.i.bf16 %v293_v29, %v291_v28 }
 0x17f   :  { %943 = vrot.lane.b32.xlu1 %v942_v30, %s1009_s18 }
 0x184   :  { %v296_v32 = vpop.f32.mrf.mxu1 }
 0x18c   :  { %v298_v36 = vpop.f32.mrf.mxu1 }
 0x18d   :  { %v947_v38 = vpack.i.bf16 %v298_v36, %v296_v32 }
 0x18f   :  { %948 = vrot.lane.b32.xlu2 %v947_v38, %s1009_s18 }
 0x194   :  { %v301_v40 = vpop.f32.mrf.mxu1 }
 0x19c   :  { %v303_v42 = vpop.f32.mrf.mxu1 }
 0x19d   :  { %v952_v43 = vpack.i.bf16 %v303_v42, %v301_v40 }
 0x19f   :  { %953 = vrot.lane.b32.xlu2 %v952_v43, %s1009_s18 }
 0x1a4   :  { %v306_v47 = vpop.f32.mrf.mxu1 }
 0x1ac   :  { %v308_v48 = vpop.f32.mrf.mxu1 }
 0x1ad   :  { %v957_v50 = vpack.i.bf16 %v308_v48, %v306_v47 }
 0x1af   :  { %958 = vrot.lane.b32.xlu0 %v957_v50, %s1009_s18 }
 0x1b4   :  { %v311_v51 = vpop.f32.mrf.mxu1 }
 0x1bc   :  { %v313_v52 = vpop.f32.mrf.mxu1 }
 0x1bd   :  { %v962_v54 = vpack.i.bf16 %v313_v52, %v311_v51 }
 0x1bf   :  { %963 = vrot.lane.b32.xlu1 %v962_v54, %s1009_s18 }
 0x1c1   :  { %v929_v56 = vpop.permute.xlu0 %928 }
 0x1c2   :  { %v931_v57 = vunpack.i.h.bf16 %v929_v56  ;;  %v930_v58 = vunpack.i.l.bf16 %v929_v56 }
 0x1c4   :  { %v382_v62 = vsel %vm380_vm1, %v1218_v8, %v931_v57  ;;  %v381_v63 = vsel %vm380_vm1, %v1216_v7, %v930_v58 }
 0x1c5   :  { %v397_v0 = vpack.c.bf16 %v382_v62, %v381_v63 }
 0x1c7   :  { %869 = vmatmul.msk.bf16.vlgmr.msrb.gmra.mxu2 %vm441_vm2, %v397_v0 }
 0x1d1   :  { %v934_v1 = vpop.permute.xlu0 %933 }
 0x1d2   :  { %v936_v4 = vunpack.i.h.bf16 %v934_v1  ;;  %v935_v5 = vunpack.i.l.bf16 %v934_v1 }
 0x1d4   :  { %v383_v6 = vsel %vm380_vm1, %v1206_v3, %v935_v5  ;;  %v384_v9 = vsel %vm380_vm1, %v1204_v2, %v936_v4 }
 0x1d5   :  { %v398_v10 = vpack.c.bf16 %v384_v9, %v383_v6 }
 0x1d7   :  { %870 = vmatmul.msk.bf16.gmra.mxu2 %vm441_vm2, %v398_v10 }
 0x1e1   :  { %v939_v8 = vpop.permute.xlu1 %938 }
 0x1e2   :  { %v941_v19 = vunpack.i.h.bf16 %v939_v8  ;;  %v940_v20 = vunpack.i.l.bf16 %v939_v8 }
 0x1e4   :  { %v385_v7 = vsel %vm380_vm1, %v1192_v60, %v940_v20  ;;  %v386_v21 = vsel %vm380_vm1, %v1194_v61, %v941_v19 }
 0x1e5   :  { %v399_v22 = vpack.c.bf16 %v386_v21, %v385_v7 }
 0x1e7   :  { %871 = vmatmul.msk.bf16.gmra.mxu2 %vm441_vm2, %v399_v22 }
 0x1e9   :  { %v949_v27 = vpop.permute.xlu2 %948 }
 0x1ea   :  { %v951_v60 = vunpack.i.h.bf16 %v949_v27  ;;  %v950_v28 = vunpack.i.l.bf16 %v949_v27 }
 0x1ec   :  { %v389_v61 = vsel %vm380_vm1, %v1175_v53, %v950_v28  ;;  %v390_v29 = vsel %vm380_vm1, %v1168_v49, %v951_v60 }
 0x1ed   :  { %v401_v30 = vpack.c.bf16 %v390_v29, %v389_v61 }
 0x1f1   :  { %v944_v23 = vpop.permute.xlu1 %943 }
 0x1f2   :  { %v946_v3 = vunpack.i.h.bf16 %v944_v23  ;;  %v945_v24 = vunpack.i.l.bf16 %v944_v23 }
 0x1f4   :  { %v387_v2 = vsel %vm380_vm1, %v1180_v55, %v945_v24  ;;  %v388_v25 = vsel %vm380_vm1, %v1190_v59, %v946_v3 }
 0x1f5   :  { %v400_v26 = vpack.c.bf16 %v388_v25, %v387_v2 }
 0x1f7   :  { %872 = vmatmul.msk.bf16.gmra.mxu2 %vm441_vm2, %v400_v26 }
 0x1f9   :  { %v954_v31 = vpop.permute.xlu2 %953 }
 0x1fa   :  { %v956_v55 = vunpack.i.h.bf16 %v954_v31  ;;  %v955_v32 = vunpack.i.l.bf16 %v954_v31 }
 0x1fc   :  { %v391_v59 = vsel %vm380_vm1, %v1161_v45, %v955_v32  ;;  %v392_v35 = vsel %vm380_vm1, %v1163_v46, %v956_v55 }
 0x1fd   :  { %v402_v36 = vpack.c.bf16 %v392_v35, %v391_v59 }
 0x207   :  { %873 = vmatmul.msk.bf16.gmra.mxu2 %vm441_vm2, %v401_v30 }
 0x217   :  { %874 = vmatmul.msk.bf16.gmra.mxu2 %vm441_vm2, %v402_v36 }
 0x221   :  { %v959_v38 = vpop.permute.xlu0 %958 }
 0x222   :  { %v961_v53 = vunpack.i.h.bf16 %v959_v38  ;;  %v960_v40 = vunpack.i.l.bf16 %v959_v38 }
 0x224   :  { %v393_v49 = vsel %vm380_vm1, %v1148_v39, %v960_v40  ;;  %v394_v41 = vsel %vm380_vm1, %v1144_v37, %v961_v53 }
 0x225   :  { %v403_v42 = vpack.c.bf16 %v394_v41, %v393_v49 }
 0x227   :  { %875 = vmatmul.msk.bf16.gmra.mxu2 %vm441_vm2, %v403_v42 }
 0x231   :  { %v964_v43 = vpop.permute.xlu1 %963 }
 0x232   :  { %v966_v45 = vunpack.i.h.bf16 %v964_v43  ;;  %v965_v44 = vunpack.i.l.bf16 %v964_v43 }
 0x234   :  { %v395_v46 = vsel %vm380_vm1, %v1137_v33, %v965_v44  ;;  %v396_v47 = vsel %vm380_vm1, %v1139_v34, %v966_v45  ;;  %v1007_v34 = vld [vmem:[%s1541_s5] ss:$0 sm:$0xff] }
 0x235   :  { %v404_v48 = vpack.c.bf16 %v396_v47, %v395_v46 }
 0x237   :  { %876 = vmatmul.msk.bf16.gmra.mxu2 %vm441_vm2, %v404_v48 }
 0x24a   :  { %v475_v50 = vpop.f32.mrf.mxu2 }
 0x24b   :  { %v476_v45 = vadd.f32 %v1007_v34, %v475_v50 }
 0x24d   :  { %v515_v48 = vmax.f32 %v476_v45, 0.0 }
 0x252   :  { %v477_v39 = vpop.f32.mrf.mxu2 }
 0x253   :  { %v478_v41 = vadd.f32 %v1007_v34, %v477_v39 }
 0x255   :  { %v516_v46 = vmax.f32 %v478_v41, 0.0 }
 0x257   :  { %v531_v39 = vpack.c.bf16 %v516_v46, %v515_v48 }
 0x25a   :  { %v480_v51 = vpop.f32.mrf.mxu2 }
 0x25b   :  { %v1392_v40 = vadd.f32 %v1007_v34, %v480_v51 }
 0x25d   :  { %v517_v44 = vmax.f32 %v1392_v40, 0.0 }
 0x262   :  { %v482_v52 = vpop.f32.mrf.mxu2 }
 0x263   :  { %v1385_v36 = vadd.f32 %v1007_v34, %v482_v52 }
 0x265   :  { %v518_v42 = vmax.f32 %v1385_v36, 0.0 }
 0x267   :  { %v532_v47 = vpack.c.bf16 %v518_v42, %v517_v44 }
 0x26a   :  { %v485_v37 = vpop.f32.mrf.mxu2 }
 0x26b   :  { %v1382_v59 = vadd.f32 %v1007_v34, %v485_v37 }
 0x26d   :  { %v519_v49 = vmax.f32 %v1382_v59, 0.0 }
 0x272   :  { %v487_v54 = vpop.f32.mrf.mxu2 }
 0x273   :  { %v1375_v31 = vadd.f32 %v1007_v34, %v487_v54 }
 0x275   :  { %v520_v38 = vmax.f32 %v1375_v31, 0.0 }
 0x277   :  { %v533_v43 = vpack.c.bf16 %v520_v38, %v519_v49 }
 0x27a   :  { %v490_v56 = vpop.f32.mrf.mxu2 }
 0x27b   :  { %v1372_v29 = vadd.f32 %v1007_v34, %v490_v56  ;;  %v915_v56 = vld [vmem:[%s1542_s6 + $0x10] sm:$0xff] }
 0x27d   :  { %v521_v35 = vmax.f32 %v1372_v29, 0.0 }
 0x282   :  { %v492_v57 = vpop.f32.mrf.mxu2 }
 0x283   :  { %v1365_v60 = vadd.f32 %v1007_v34, %v492_v57 }
 0x285   :  { %v522_v55 = vmax.f32 %v1365_v60, 0.0 }
 0x287   :  { %v534_v53 = vpack.c.bf16 %v522_v55, %v521_v35 }
 0x28a   :  { %v495_v58 = vpop.f32.mrf.mxu2 }
 0x28b   :  { %v1362_v26 = vadd.f32 %v1007_v34, %v495_v58  ;;  %v914_v58 = vld [vmem:[%s1542_s6 + $0x8] sm:$0xff] }
 0x28d   :  { %v523_v30 = vmax.f32 %v1362_v26, 0.0 }
 0x292   :  { %v497_v62 = vpop.f32.mrf.mxu2 }
 0x293   :  { %v1355_v24 = vadd.f32 %v1007_v34, %v497_v62  ;;  %v913_v62 = vld [vmem:[%s1542_s6] sm:$0xff] }
 0x295   :  { %v524_v28 = vmax.f32 %v1355_v24, 0.0 }
 0x297   :  { %v535_v32 = vpack.c.bf16 %v524_v28, %v523_v30 }
 0x29a   :  { %v500_v63 = vpop.f32.mrf.mxu2 }
 0x29b   :  { %v1352_v23 = vadd.f32 %v1007_v34, %v500_v63 }
 0x29d   :  { %v525_v27 = vmax.f32 %v1352_v23, 0.0 }
 0x2a2   :  { %v502_v0 = vpop.f32.mrf.mxu2 }
 0x2a3   :  { %v1345_v7 = vadd.f32 %v1007_v34, %v502_v0 }
 0x2a5   :  { %v526_v2 = vmax.f32 %v1345_v7, 0.0  ;;  %v1008_v7 = vld [vmem:[%s1543_s7] ss:$0 sm:$0xff] }
 0x2a7   :  { %v536_v61 = vpack.c.bf16 %v526_v2, %v525_v27 }
 0x2aa   :  { %v505_v1 = vpop.f32.mrf.mxu2 }
 0x2ab   :  { %v1341_v8 = vadd.f32 %v1007_v34, %v505_v1 }
 0x2ad   :  { %v527_v3 = vmax.f32 %v1341_v8, 0.0 }
 0x2b2   :  { %v507_v33 = vpop.f32.mrf.mxu2 }
 0x2b3   :  { %v1337_v9 = vadd.f32 %v1007_v34, %v507_v33 }
 0x2b5   :  { %v528_v21 = vmax.f32 %v1337_v9, 0.0 }
 0x2b7   :  { %v537_v25 = vpack.c.bf16 %v528_v21, %v527_v3 }
 0x2ba   :  { %v510_v4 = vpop.f32.mrf.mxu2 }
 0x2bb   :  { %v1335_v5 = vadd.f32 %v1007_v34, %v510_v4 }
 0x2bd   :  { %v529_v19 = vmax.f32 %v1335_v5, 0.0 }
 0x2c2   :  { %v512_v6 = vpop.f32.mrf.mxu2 }
 0x2c3   :  { %v1339_v10 = vadd.f32 %v1007_v34, %v512_v6 }
 0x2c5   :  { %v530_v20 = vmax.f32 %v1339_v10, 0.0 }
 0x2c7   :  { %v538_v22 = vpack.c.bf16 %v530_v20, %v529_v19 }
 0x2c9   :  { %539 = vmatpush.bf16.msrb.mxu3 %v538_v22 }
 0x2cd   :  { %540 = vmatpush.bf16.msrb.mxu3 %v537_v25 }
 0x2d1   :  { %541 = vmatpush.bf16.msrb.mxu3 %v536_v61 }
 0x2d5   :  { %542 = vmatpush.bf16.msrb.mxu3 %v535_v32 }
 0x2d9   :  { %543 = vmatpush.bf16.msrb.mxu3 %v534_v53 }
 0x2dd   :  { %544 = vmatpush.bf16.msrb.mxu3 %v533_v43 }
 0x2e1   :  { %545 = vmatpush.bf16.msrb.mxu3 %v532_v47 }
 0x2e5   :  { %546 = vmatpush.bf16.msrb.mxu3 %v531_v39 }
 0x2e8   :  { %547 = vmatmul.bf16.vlgmr.msrb.gmra.mxu3 %v1227_v11 }
 0x2f8   :  { %552 = vmatmul.bf16.gmra.mxu3 %v1233_v12 }
 0x308   :  { %557 = vmatmul.bf16.gmra.mxu3 %v1239_v13 }
 0x318   :  { %562 = vmatmul.bf16.gmra.mxu3 %v1245_v14 }
 0x328   :  { %567 = vmatmul.bf16.gmra.mxu3 %v1251_v15 }
 0x338   :  { %572 = vmatmul.bf16.gmra.mxu3 %v1257_v16 }
 0x348   :  { %577 = vmatmul.bf16.gmra.mxu3 %v1263_v17 }
 0x358   :  { %582 = vmatmul.bf16.gmra.mxu3 %v1269_v18  ;;  %v916_v18 = vld [vmem:[%s1542_s6 + $0x18] sm:$0xff] }
 0x359   :  { %740 = vmatpush.bf16.msrb.mxu0 %v916_v18 }
 0x35d   :  { %741 = vmatpush.bf16.msrb.mxu0 %v915_v56 }
 0x361   :  { %742 = vmatpush.bf16.msrb.mxu0 %v914_v58 }
 0x365   :  { %743 = vmatpush.bf16.msrb.mxu0 %v913_v62 }
 0x36b   :  { %v548_v50 = vpop.f32.mrf.mxu3 }
 0x373   :  { %v550_v51 = vpop.f32.mrf.mxu3 }
 0x374   :  { %v967_v52 = vpack.i.bf16 %v550_v51, %v548_v50 }
 0x376   :  { %968 = vrot.lane.b32.xlu2 %v967_v52, %s1009_s18 }
 0x37b   :  { %v553_v11 = vpop.f32.mrf.mxu3 }
 0x383   :  { %v555_v37 = vpop.f32.mrf.mxu3 }
 0x384   :  { %v972_v12 = vpack.i.bf16 %v555_v37, %v553_v11 }
 0x386   :  { %973 = vrot.lane.b32.xlu0 %v972_v12, %s1009_s18 }
 0x38b   :  { %v558_v13 = vpop.f32.mrf.mxu3 }
 0x393   :  { %v560_v14 = vpop.f32.mrf.mxu3 }
 0x394   :  { %v977_v54 = vpack.i.bf16 %v560_v14, %v558_v13 }
 0x396   :  { %978 = vrot.lane.b32.xlu1 %v977_v54, %s1009_s18 }
 0x39b   :  { %v563_v15 = vpop.f32.mrf.mxu3 }
 0x3a3   :  { %v565_v16 = vpop.f32.mrf.mxu3 }
 0x3a4   :  { %v982_v17 = vpack.i.bf16 %v565_v16, %v563_v15 }
 0x3a6   :  { %983 = vrot.lane.b32.xlu2 %v982_v17, %s1009_s18 }
 0x3ab   :  { %v568_v57 = vpop.f32.mrf.mxu3 }
 0x3b3   :  { %v570_v63 = vpop.f32.mrf.mxu3 }
 0x3b4   :  { %v987_v0 = vpack.i.bf16 %v570_v63, %v568_v57 }
 0x3b6   :  { %988 = vrot.lane.b32.xlu0 %v987_v0, %s1009_s18 }
 0x3bb   :  { %v573_v1 = vpop.f32.mrf.mxu3 }
 0x3c3   :  { %v575_v33 = vpop.f32.mrf.mxu3 }
 0x3c4   :  { %v992_v4 = vpack.i.bf16 %v575_v33, %v573_v1 }
 0x3c6   :  { %993 = vrot.lane.b32.xlu1 %v992_v4, %s1009_s18 }
 0x3cb   :  { %v578_v34 = vpop.f32.mrf.mxu3 }
 0x3d0   :  { %v969_v6 = vpop.permute.xlu2 %968 }
 0x3d1   :  { %v971_v22 = vunpack.i.h.bf16 %v969_v6  ;;  %v970_v25 = vunpack.i.l.bf16 %v969_v6 }
 0x3d3   :  { %v653_v61 = vsel %vm380_vm1, %v516_v46, %v971_v22  ;;  %v652_v32 = vsel %vm380_vm1, %v515_v48, %v970_v25  ;;  %v580_v53 = vpop.f32.mrf.mxu3 }
 0x3d4   :  { %v668_v41 = vpack.c.bf16 %v653_v61, %v652_v32  ;;  %v997_v43 = vpack.i.bf16 %v580_v53, %v578_v34 }
 0x3d6   :  { %893 = vmatmul.msk.bf16.vlgmr.msrb.gmra.mxu0 %vm441_vm2, %v668_v41  ;;  %998 = vrot.lane.b32.xlu2 %v997_v43, %s1009_s18 }
 0x3db   :  { %v583_v45 = vpop.f32.mrf.mxu3 }
 0x3e3   :  { %v585_v47 = vpop.f32.mrf.mxu3 }
 0x3e4   :  { %v1002_v39 = vpack.i.bf16 %v585_v47, %v583_v45 }
 0x3e6   :  { %1003 = vrot.lane.b32.xlu0 %v1002_v39, %s1009_s18 }
 0x3f8   :  { %v974_v50 = vpop.permute.xlu0 %973 }
 0x3f9   :  { %v976_v51 = vunpack.i.h.bf16 %v974_v50  ;;  %v975_v52 = vunpack.i.l.bf16 %v974_v50 }
 0x3fb   :  { %v654_v46 = vsel %vm380_vm1, %v517_v44, %v975_v52  ;;  %v655_v48 = vsel %vm380_vm1, %v518_v42, %v976_v51 }
 0x3fc   :  { %v669_v11 = vpack.c.bf16 %v655_v48, %v654_v46 }
 0x3fe   :  { %894 = vmatmul.msk.bf16.gmra.mxu0 %vm441_vm2, %v669_v11 }
 0x400   :  { %v984_v36 = vpop.permute.xlu2 %983 }
 0x401   :  { %v986_v44 = vunpack.i.h.bf16 %v984_v36  ;;  %v985_v42 = vunpack.i.l.bf16 %v984_v36 }
 0x403   :  { %v658_v15 = vsel %vm380_vm1, %v521_v35, %v985_v42  ;;  %v659_v59 = vsel %vm380_vm1, %v522_v55, %v986_v44 }
 0x404   :  { %v671_v16 = vpack.c.bf16 %v659_v59, %v658_v15 }
 0x408   :  { %v979_v37 = vpop.permute.xlu1 %978 }
 0x409   :  { %v981_v12 = vunpack.i.h.bf16 %v979_v37  ;;  %v980_v13 = vunpack.i.l.bf16 %v979_v37 }
 0x40b   :  { %v656_v14 = vsel %vm380_vm1, %v519_v49, %v980_v13  ;;  %v657_v40 = vsel %vm380_vm1, %v520_v38, %v981_v12 }
 0x40c   :  { %v670_v54 = vpack.c.bf16 %v657_v40, %v656_v14 }
 0x40e   :  { %895 = vmatmul.msk.bf16.gmra.mxu0 %vm441_vm2, %v670_v54 }
 0x41e   :  { %896 = vmatmul.msk.bf16.gmra.mxu0 %vm441_vm2, %v671_v16 }
 0x428   :  { %v989_v31 = vpop.permute.xlu0 %988 }
 0x429   :  { %v991_v49 = vunpack.i.h.bf16 %v989_v31  ;;  %v990_v38 = vunpack.i.l.bf16 %v989_v31 }
 0x42b   :  { %v660_v17 = vsel %vm380_vm1, %v523_v30, %v990_v38  ;;  %v661_v29 = vsel %vm380_vm1, %v524_v28, %v991_v49 }
 0x42c   :  { %v672_v18 = vpack.c.bf16 %v661_v29, %v660_v17 }
 0x42e   :  { %897 = vmatmul.msk.bf16.gmra.mxu0 %vm441_vm2, %v672_v18 }
 0x430   :  { %v999_v24 = vpop.permute.xlu2 %998 }
 0x431   :  { %v1001_v30 = vunpack.i.h.bf16 %v999_v24  ;;  %v1000_v28 = vunpack.i.l.bf16 %v999_v24 }
 0x433   :  { %v664_v58 = vsel %vm380_vm1, %v527_v3, %v1000_v28  ;;  %v665_v23 = vsel %vm380_vm1, %v528_v21, %v1001_v30 }
 0x434   :  { %v674_v62 = vpack.c.bf16 %v665_v23, %v664_v58 }
 0x438   :  { %v994_v60 = vpop.permute.xlu1 %993 }
 0x439   :  { %v996_v35 = vunpack.i.h.bf16 %v994_v60  ;;  %v995_v55 = vunpack.i.l.bf16 %v994_v60 }
 0x43b   :  { %v662_v56 = vsel %vm380_vm1, %v525_v27, %v995_v55  ;;  %v663_v26 = vsel %vm380_vm1, %v526_v2, %v996_v35 }
 0x43c   :  { %v673_v57 = vpack.c.bf16 %v663_v26, %v662_v56 }
 0x43e   :  { %898 = vmatmul.msk.bf16.gmra.mxu0 %vm441_vm2, %v673_v57 }
 0x44e   :  { %899 = vmatmul.msk.bf16.gmra.mxu0 %vm441_vm2, %v674_v62 }
 0x453   :  { %v745_v2 = vpop.f32.mrf.mxu0 }
 0x454   :  { %v746_v27 = vadd.f32 %v1008_v7, %v745_v2 }
 0x456   :  { %785 = vst [vmem:[%s1544_s8] sm:$0xff] %v746_v27 }
 0x458   :  { %v1004_v8 = vpop.permute.xlu0 %1003 }
 0x459   :  { %v1006_v63 = vunpack.i.h.bf16 %v1004_v8  ;;  %v1005_v3 = vunpack.i.l.bf16 %v1004_v8 }
 0x45b   :  { %v747_v0 = vpop.f32.mrf.mxu0  ;;  %v666_v9 = vsel %vm380_vm1, %v529_v19, %v1005_v3  ;;  %v667_v21 = vsel %vm380_vm1, %v530_v20, %v1006_v63 }
 0x45c   :  { %v748_v1 = vadd.f32 %v1008_v7, %v747_v0  ;;  %v675_v33 = vpack.c.bf16 %v667_v21, %v666_v9 }
 0x45e   :  { %786 = vst [vmem:[%s1544_s8 + $0x8] sm:$0xff] %v748_v1  ;;  %900 = vmatmul.msk.bf16.gmra.mxu0 %vm441_vm2, %v675_v33 }
 0x47b   :  { %v750_v4 = vpop.f32.mrf.mxu0 }
 0x47c   :  { %v751_v34 = vadd.f32 %v1008_v7, %v750_v4 }
 0x47e   :  { %787 = vst [vmem:[%s1544_s8 + $0x10] sm:$0xff] %v751_v34 }
 0x483   :  { %v752_v5 = vpop.f32.mrf.mxu0 }
 0x484   :  { %v753_v19 = vadd.f32 %v1008_v7, %v752_v5 }
 0x486   :  { %788 = vst [vmem:[%s1544_s8 + $0x18] sm:$0xff] %v753_v19 }
 0x48b   :  { %v755_v10 = vpop.f32.mrf.mxu0 }
 0x48c   :  { %v756_v20 = vadd.f32 %v1008_v7, %v755_v10 }
 0x48e   :  { %789 = vst [vmem:[%s1544_s8 + $0x20] sm:$0xff] %v756_v20 }
 0x493   :  { %v757_v6 = vpop.f32.mrf.mxu0 }
 0x494   :  { %v758_v22 = vadd.f32 %v1008_v7, %v757_v6 }
 0x496   :  { %790 = vst [vmem:[%s1544_s8 + $0x28] sm:$0xff] %v758_v22 }
 0x49b   :  { %v760_v25 = vpop.f32.mrf.mxu0 }
 0x49c   :  { %v761_v61 = vadd.f32 %v1008_v7, %v760_v25 }
 0x49e   :  { %791 = vst [vmem:[%s1544_s8 + $0x30] sm:$0xff] %v761_v61 }
 0x4a3   :  { %v762_v32 = vpop.f32.mrf.mxu0 }
 0x4a4   :  { %v763_v53 = vadd.f32 %v1008_v7, %v762_v32 }
 0x4a6   :  { %792 = vst [vmem:[%s1544_s8 + $0x38] sm:$0xff] %v763_v53 }
 0x4ab   :  { %v765_v41 = vpop.f32.mrf.mxu0 }
 0x4ac   :  { %v766_v43 = vadd.f32 %v1008_v7, %v765_v41 }
 0x4ae   :  { %793 = vst [vmem:[%s1544_s8 + $0x40] sm:$0xff] %v766_v43 }
 0x4b3   :  { %v767_v45 = vpop.f32.mrf.mxu0 }
 0x4b4   :  { %v768_v47 = vadd.f32 %v1008_v7, %v767_v45 }
 0x4b6   :  { %794 = vst [vmem:[%s1544_s8 + $0x48] sm:$0xff] %v768_v47 }
 0x4bb   :  { %v770_v39 = vpop.f32.mrf.mxu0 }
 0x4bc   :  { %v771_v50 = vadd.f32 %v1008_v7, %v770_v39 }
 0x4be   :  { %795 = vst [vmem:[%s1544_s8 + $0x50] sm:$0xff] %v771_v50 }
 0x4c3   :  { %v772_v51 = vpop.f32.mrf.mxu0 }
 0x4c4   :  { %v773_v52 = vadd.f32 %v1008_v7, %v772_v51 }
 0x4c6   :  { %796 = vst [vmem:[%s1544_s8 + $0x58] sm:$0xff] %v773_v52 }
 0x4cb   :  { %v775_v46 = vpop.f32.mrf.mxu0 }
 0x4cc   :  { %v776_v48 = vadd.f32 %v1008_v7, %v775_v46 }
 0x4ce   :  { %797 = vst [vmem:[%s1544_s8 + $0x60] sm:$0xff] %v776_v48 }
 0x4d3   :  { %v777_v11 = vpop.f32.mrf.mxu0 }
 0x4d4   :  { %v778_v37 = vadd.f32 %v1008_v7, %v777_v11 }
 0x4d6   :  { %798 = vst [vmem:[%s1544_s8 + $0x68] sm:$0xff] %v778_v37 }
 0x4db   :  { %v780_v12 = vpop.f32.mrf.mxu0 }
 0x4dc   :  { %v781_v13 = vadd.f32 %v1008_v7, %v780_v12 }
 0x4de   :  { %799 = vst [vmem:[%s1544_s8 + $0x70] sm:$0xff] %v781_v13 }
 0x4e3   :  { %v782_v14 = vpop.f32.mrf.mxu0 }
 0x4e4   :  { %v783_v40 = vadd.f32 %v1008_v7, %v782_v14 }
 0x4e6   :  { %800 = vst [vmem:[%s1544_s8 + $0x78] sm:$0xff] %v783_v40 }

</bundles_post_ra>
